<compile_context>
chip_gen: v6e
topology: v6e:2x2x1
jax: 0.10.0
libtpu: 0.0.40
codegen_flags: <defaults>
</compile_context>

<pallas_src>
import jax
import jax.numpy as jnp
from jax.experimental import pallas as pl
from jax.experimental.pallas import tpu as pltpu

IN_DIM = 768     # BERT-style embedding size used by the module
DIM = 128        # projection dimension ("dimension" ctor arg)


def _round_up(x, m):
    return ((x + m - 1) // m) * m


def _simdistil_kernel(x1_ref, x2_ref, w1_ref, b1_ref, w2_ref, b2_ref,
                      wd_ref, bd_ref, sim_ref, rec1_ref, rec2_ref):
    # projection1 / projection2 (Linear 768 -> DIM), bf16 MXU, f32 accumulate
    y1 = jnp.dot(x1_ref[...], w1_ref[...],
                 preferred_element_type=jnp.float32) + b1_ref[...]
    y2 = jnp.dot(x2_ref[...], w2_ref[...],
                 preferred_element_type=jnp.float32) + b2_ref[...]

    # similarityModel == 'ip': torch.mul(y1, y2).sum(dim=1)
    sim_ref[...] = jnp.sum(y1 * y2, axis=-1, keepdims=True)

    # decoder (Linear DIM -> 768): fuse both reconstructions into one MXU
    # matmul of shape [2*tile_b, DIM] @ [DIM, IN_DIM].
    y = jnp.concatenate([y1, y2], axis=0).astype(jnp.bfloat16)
    rec = jnp.dot(y, wd_ref[...],
                  preferred_element_type=jnp.float32) + bd_ref[...]
    tb = rec1_ref.shape[0]
    rec1_ref[...] = rec[:tb].astype(rec1_ref.dtype)
    rec2_ref[...] = rec[tb:].astype(rec2_ref.dtype)


def simdistil_forward(x1, x2, params, *, tile_b=512):
    """Forward pass. x1, x2: [B, 768] float32 (cast to bf16 internally)."""
    B = x1.shape[0]

    # bf16 tiles need sublane multiples of 16; clamp the tile to the (padded)
    # batch so small batches do not over-pad.
    tb = max(16, min(_round_up(tile_b, 16), _round_up(B, 16)))
    Bp = _round_up(B, tb)

    def prep(x):
        x = x.astype(jnp.bfloat16)
        if Bp != B:
            x = jnp.pad(x, ((0, Bp - B), (0, 0)))
        return x

    x1p, x2p = prep(x1), prep(x2)
    w1 = params["w1"].astype(jnp.bfloat16)
    w2 = params["w2"].astype(jnp.bfloat16)
    wd = params["wd"].astype(jnp.bfloat16)
    b1 = params["b1"].astype(jnp.float32)
    b2 = params["b2"].astype(jnp.float32)
    bd = params["bd"].astype(jnp.float32)

    grid = (Bp // tb,)

    def batch_map(i):
        return (i, 0)

    def weight_map(i):
        return (0, 0)

    sim, rec1, rec2 = pl.pallas_call(
        _simdistil_kernel,
        out_shape=(
            jax.ShapeDtypeStruct((Bp, 1), jnp.float32),
            jax.ShapeDtypeStruct((Bp, IN_DIM), jnp.bfloat16),
            jax.ShapeDtypeStruct((Bp, IN_DIM), jnp.bfloat16),
        ),
        grid_spec=pltpu.PrefetchScalarGridSpec(
            num_scalar_prefetch=0,
            grid=grid,
            in_specs=[
                pl.BlockSpec((tb, IN_DIM), batch_map),     # x1 (bf16)
                pl.BlockSpec((tb, IN_DIM), batch_map),     # x2 (bf16)
                pl.BlockSpec((IN_DIM, DIM), weight_map),   # W1 (bf16)
                pl.BlockSpec((1, DIM), weight_map),        # b1 (f32)
                pl.BlockSpec((IN_DIM, DIM), weight_map),   # W2 (bf16)
                pl.BlockSpec((1, DIM), weight_map),        # b2 (f32)
                pl.BlockSpec((DIM, IN_DIM), weight_map),   # Wd (bf16)
                pl.BlockSpec((1, IN_DIM), weight_map),     # bd (f32)
            ],
            out_specs=[
                pl.BlockSpec((tb, 1), batch_map),          # out_sim (f32)
                pl.BlockSpec((tb, IN_DIM), batch_map),     # out_recons1 (bf16)
                pl.BlockSpec((tb, IN_DIM), batch_map),     # out_recons2 (bf16)
            ],
        ),
        compiler_params=pltpu.CompilerParams(
            dimension_semantics=("parallel",)),
    )(x1p, x2p, w1, b1, w2, b2, wd, bd)

    return sim[:B, 0], (rec1[:B], rec2[:B])


def init_params(key):
    """Deterministic nn.Linear-style init (uniform +-1/sqrt(fan_in)).

    Weights stored pre-transposed as [in_features, out_features]."""
    ks = jax.random.split(key, 6)

    def lin(kw, kb, fan_in, fan_out):
        bound = 1.0 / jnp.sqrt(fan_in)
        w = jax.random.uniform(kw, (fan_in, fan_out), jnp.float32, -bound, bound)
        b = jax.random.uniform(kb, (1, fan_out), jnp.float32, -bound, bound)
        return w, b

    w1, b1 = lin(ks[0], ks[1], IN_DIM, DIM)   # projection1
    w2, b2 = lin(ks[2], ks[3], IN_DIM, DIM)   # projection2 (merge=False)
    wd, bd = lin(ks[4], ks[5], DIM, IN_DIM)   # decoder
    return {"w1": w1, "b1": b1, "w2": w2, "b2": b2, "wd": wd, "bd": bd}


def _reference_forward(x1, x2, p):
    """Pure-JAX reference mirroring the kernel numerics (bf16 in, f32 acc)."""
    x1b, x2b = x1.astype(jnp.bfloat16), x2.astype(jnp.bfloat16)
    w1, w2, wd = (p["w1"].astype(jnp.bfloat16), p["w2"].astype(jnp.bfloat16),
                  p["wd"].astype(jnp.bfloat16))
    y1 = jnp.dot(x1b, w1, preferred_element_type=jnp.float32) + p["b1"]
    y2 = jnp.dot(x2b, w2, preferred_element_type=jnp.float32) + p["b2"]
    sim = jnp.sum(y1 * y2, axis=1)
    rec1 = jnp.dot(y1.astype(jnp.bfloat16), wd,
                   preferred_element_type=jnp.float32) + p["bd"]
    rec2 = jnp.dot(y2.astype(jnp.bfloat16), wd,
                   preferred_element_type=jnp.float32) + p["bd"]
    return sim, rec1, rec2


if __name__ == "__main__":
    key = jax.random.PRNGKey(0)
    kp, kx1, kx2 = jax.random.split(key, 3)

    # Small test shapes: B=40 with tile_b=16 exercises a multi-step grid and
    # the padded tail tile (40 -> 48).
    B = 40
    params = init_params(kp)
    x1 = jax.random.normal(kx1, (B, IN_DIM), jnp.float32)
    x2 = jax.random.normal(kx2, (B, IN_DIM), jnp.float32)

    out_sim, (rec1, rec2) = simdistil_forward(x1, x2, params, tile_b=16)
    jax.block_until_ready((out_sim, rec1, rec2))

    # sanity check against pure-JAX reference (same bf16/f32 numerics)
    ref_sim, ref_rec1, ref_rec2 = _reference_forward(x1, x2, params)
    assert jnp.allclose(out_sim, ref_sim, atol=2e-2, rtol=2e-2)
    assert jnp.allclose(rec1.astype(jnp.float32), ref_rec1, atol=2e-2, rtol=2e-2)
    assert jnp.allclose(rec2.astype(jnp.float32), ref_rec2, atol=2e-2, rtol=2e-2)
    assert out_sim.shape == (B,)
    assert rec1.shape == (B, IN_DIM) and rec2.shape == (B, IN_DIM)

    print("KERNEL_OK")
</pallas_src>

<mosaic_0001>
module attributes {stable_mosaic.version = 11 : i64} {
  func.func @_simdistil_kernel(%arg0: i32, %arg1: memref<16x768xbf16, #tpu.memory_space<vmem>>, %arg2: memref<16x768xbf16, #tpu.memory_space<vmem>>, %arg3: memref<768x128xbf16, #tpu.memory_space<vmem>>, %arg4: memref<1x128xf32, #tpu.memory_space<vmem>>, %arg5: memref<768x128xbf16, #tpu.memory_space<vmem>>, %arg6: memref<1x128xf32, #tpu.memory_space<vmem>>, %arg7: memref<128x768xbf16, #tpu.memory_space<vmem>>, %arg8: memref<1x768xf32, #tpu.memory_space<vmem>>, %arg9: memref<16x1xf32, #tpu.memory_space<vmem>>, %arg10: memref<16x768xbf16, #tpu.memory_space<vmem>>, %arg11: memref<16x768xbf16, #tpu.memory_space<vmem>>) attributes {dimension_semantics = [#tpu.dimension_semantics<parallel>], iteration_bounds = array<i64: 3>, scalar_prefetch = 0 : i64, scratch_operands = 0 : i64, tpu.core_type = #tpu.core_type<tc>, window_params = [{transform_indices = @transform_0, window_bounds = array<i64: 16, 768>}, {transform_indices = @transform_1, window_bounds = array<i64: 16, 768>}, {pipeline_mode = #tpu.pipeline_mode<synchronous>, transform_indices = @transform_2, window_bounds = array<i64: 768, 128>}, {pipeline_mode = #tpu.pipeline_mode<synchronous>, transform_indices = @transform_3, window_bounds = array<i64: 1, 128>}, {pipeline_mode = #tpu.pipeline_mode<synchronous>, transform_indices = @transform_4, window_bounds = array<i64: 768, 128>}, {pipeline_mode = #tpu.pipeline_mode<synchronous>, transform_indices = @transform_5, window_bounds = array<i64: 1, 128>}, {pipeline_mode = #tpu.pipeline_mode<synchronous>, transform_indices = @transform_6, window_bounds = array<i64: 128, 768>}, {pipeline_mode = #tpu.pipeline_mode<synchronous>, transform_indices = @transform_7, window_bounds = array<i64: 1, 768>}, {transform_indices = @transform_8, window_bounds = array<i64: 16, 1>}, {transform_indices = @transform_9, window_bounds = array<i64: 16, 768>}, {transform_indices = @transform_10, window_bounds = array<i64: 16, 768>}]} {
    %c0 = arith.constant 0 : index
    %c0_0 = arith.constant 0 : index
    %0 = vector.load %arg1[%c0, %c0_0] : memref<16x768xbf16, #tpu.memory_space<vmem>>, vector<16x768xbf16>
    %c0_1 = arith.constant 0 : index
    %c0_2 = arith.constant 0 : index
    %1 = vector.load %arg3[%c0_1, %c0_2] : memref<768x128xbf16, #tpu.memory_space<vmem>>, vector<768x128xbf16>
    %cst = arith.constant dense<0.000000e+00> : vector<16x128xf32>
    %2 = tpu.matmul %0, %1, %cst {dimension_numbers = #tpu.dot_dimension_numbers<[1], [0], [0], [1], [0, 0, 1, 1], [], []>} : vector<16x768xbf16>, vector<768x128xbf16>, vector<16x128xf32> -> vector<16x128xf32>
    %c0_3 = arith.constant 0 : index
    %c0_4 = arith.constant 0 : index
    %3 = vector.load %arg4[%c0_3, %c0_4] : memref<1x128xf32, #tpu.memory_space<vmem>>, vector<1x128xf32>
    %4 = vector.broadcast %3 : vector<1x128xf32> to vector<16x128xf32>
    %5 = arith.addf %2, %4 : vector<16x128xf32>
    %c0_5 = arith.constant 0 : index
    %c0_6 = arith.constant 0 : index
    %6 = vector.load %arg2[%c0_5, %c0_6] : memref<16x768xbf16, #tpu.memory_space<vmem>>, vector<16x768xbf16>
    %c0_7 = arith.constant 0 : index
    %c0_8 = arith.constant 0 : index
    %7 = vector.load %arg5[%c0_7, %c0_8] : memref<768x128xbf16, #tpu.memory_space<vmem>>, vector<768x128xbf16>
    %cst_9 = arith.constant dense<0.000000e+00> : vector<16x128xf32>
    %8 = tpu.matmul %6, %7, %cst_9 {dimension_numbers = #tpu.dot_dimension_numbers<[1], [0], [0], [1], [0, 0, 1, 1], [], []>} : vector<16x768xbf16>, vector<768x128xbf16>, vector<16x128xf32> -> vector<16x128xf32>
    %c0_10 = arith.constant 0 : index
    %c0_11 = arith.constant 0 : index
    %9 = vector.load %arg6[%c0_10, %c0_11] : memref<1x128xf32, #tpu.memory_space<vmem>>, vector<1x128xf32>
    %10 = vector.broadcast %9 : vector<1x128xf32> to vector<16x128xf32>
    %11 = arith.addf %8, %10 : vector<16x128xf32>
    %12 = arith.mulf %5, %11 : vector<16x128xf32>
    %cst_12 = arith.constant dense<0.000000e+00> : vector<16xf32>
    %13 = vector.multi_reduction <add>, %12, %cst_12 [1] : vector<16x128xf32> to vector<16xf32>
    %14 = vector.shape_cast %13 : vector<16xf32> to vector<16x1xf32>
    %c0_13 = arith.constant 0 : index
    %c0_14 = arith.constant 0 : index
    %15 = vector.load %arg9[%c0_13, %c0_14] : memref<16x1xf32, #tpu.memory_space<vmem>>, vector<16x1xf32>
    tpu.vector_store %arg9[%c0_13, %c0_14], %14 {strides = array<i32>} : memref<16x1xf32, #tpu.memory_space<vmem>>, vector<16x1xf32>,
    %16 = tpu.concatenate %5, %11 in 0 : vector<16x128xf32>, vector<16x128xf32> -> vector<32x128xf32>
    %17 = arith.truncf %16 : vector<32x128xf32> to vector<32x128xbf16>
    %c0_15 = arith.constant 0 : index
    %c0_16 = arith.constant 0 : index
    %18 = vector.load %arg7[%c0_15, %c0_16] : memref<128x768xbf16, #tpu.memory_space<vmem>>, vector<128x768xbf16>
    %cst_17 = arith.constant dense<0.000000e+00> : vector<32x768xf32>
    %19 = tpu.matmul %17, %18, %cst_17 {dimension_numbers = #tpu.dot_dimension_numbers<[1], [0], [0], [1], [0, 0, 1, 1], [], []>} : vector<32x128xbf16>, vector<128x768xbf16>, vector<32x768xf32> -> vector<32x768xf32>
    %c0_18 = arith.constant 0 : index
    %c0_19 = arith.constant 0 : index
    %20 = vector.load %arg8[%c0_18, %c0_19] : memref<1x768xf32, #tpu.memory_space<vmem>>, vector<1x768xf32>
    %21 = vector.broadcast %20 : vector<1x768xf32> to vector<32x768xf32>
    %22 = arith.addf %19, %21 : vector<32x768xf32>
    %23 = vector.extract_strided_slice %22 {offsets = [0, 0], sizes = [16, 768], strides = [1, 1]} : vector<32x768xf32> to vector<16x768xf32>
    %24 = arith.truncf %23 : vector<16x768xf32> to vector<16x768xbf16>
    %c0_20 = arith.constant 0 : index
    %c0_21 = arith.constant 0 : index
    %25 = vector.load %arg10[%c0_20, %c0_21] : memref<16x768xbf16, #tpu.memory_space<vmem>>, vector<16x768xbf16>
    tpu.vector_store %arg10[%c0_20, %c0_21], %24 {strides = array<i32>} : memref<16x768xbf16, #tpu.memory_space<vmem>>, vector<16x768xbf16>,
    %26 = vector.extract_strided_slice %22 {offsets = [16, 0], sizes = [16, 768], strides = [1, 1]} : vector<32x768xf32> to vector<16x768xf32>
    %27 = arith.truncf %26 : vector<16x768xf32> to vector<16x768xbf16>
    %c0_22 = arith.constant 0 : index
    %c0_23 = arith.constant 0 : index
    %28 = vector.load %arg11[%c0_22, %c0_23] : memref<16x768xbf16, #tpu.memory_space<vmem>>, vector<16x768xbf16>
    tpu.vector_store %arg11[%c0_22, %c0_23], %27 {strides = array<i32>} : memref<16x768xbf16, #tpu.memory_space<vmem>>, vector<16x768xbf16>,
    return
  }
  func.func @transform_0(%arg0: i32) -> (i32, i32) {
    %c0_i32 = arith.constant 0 : i32
    %c0_i32_0 = arith.constant 0 : i32
    return %arg0, %c0_i32 : i32, i32
  }
  func.func @transform_1(%arg0: i32) -> (i32, i32) {
    %c0_i32 = arith.constant 0 : i32
    %c0_i32_0 = arith.constant 0 : i32
    return %arg0, %c0_i32 : i32, i32
  }
  func.func @transform_2(%arg0: i32) -> (i32, i32) {
    %c0_i32 = arith.constant 0 : i32
    %c0_i32_0 = arith.constant 0 : i32
    %c0_i32_1 = arith.constant 0 : i32
    return %c0_i32, %c0_i32_0 : i32, i32
  }
  func.func @transform_3(%arg0: i32) -> (i32, i32) {
    %c0_i32 = arith.constant 0 : i32
    %c0_i32_0 = arith.constant 0 : i32
    %c0_i32_1 = arith.constant 0 : i32
    return %c0_i32, %c0_i32_0 : i32, i32
  }
  func.func @transform_4(%arg0: i32) -> (i32, i32) {
    %c0_i32 = arith.constant 0 : i32
    %c0_i32_0 = arith.constant 0 : i32
    %c0_i32_1 = arith.constant 0 : i32
    return %c0_i32, %c0_i32_0 : i32, i32
  }
  func.func @transform_5(%arg0: i32) -> (i32, i32) {
    %c0_i32 = arith.constant 0 : i32
    %c0_i32_0 = arith.constant 0 : i32
    %c0_i32_1 = arith.constant 0 : i32
    return %c0_i32, %c0_i32_0 : i32, i32
  }
  func.func @transform_6(%arg0: i32) -> (i32, i32) {
    %c0_i32 = arith.constant 0 : i32
    %c0_i32_0 = arith.constant 0 : i32
    %c0_i32_1 = arith.constant 0 : i32
    return %c0_i32, %c0_i32_0 : i32, i32
  }
  func.func @transform_7(%arg0: i32) -> (i32, i32) {
    %c0_i32 = arith.constant 0 : i32
    %c0_i32_0 = arith.constant 0 : i32
    %c0_i32_1 = arith.constant 0 : i32
    return %c0_i32, %c0_i32_0 : i32, i32
  }
  func.func @transform_8(%arg0: i32) -> (i32, i32) {
    %c0_i32 = arith.constant 0 : i32
    %c0_i32_0 = arith.constant 0 : i32
    return %arg0, %c0_i32 : i32, i32
  }
  func.func @transform_9(%arg0: i32) -> (i32, i32) {
    %c0_i32 = arith.constant 0 : i32
    %c0_i32_0 = arith.constant 0 : i32
    return %arg0, %c0_i32 : i32, i32
  }
  func.func @transform_10(%arg0: i32) -> (i32, i32) {
    %c0_i32 = arith.constant 0 : i32
    %c0_i32_0 = arith.constant 0 : i32
    return %arg0, %c0_i32 : i32, i32
  }
}

</mosaic_0001>

<bundles_post_ra>
// kernel: tpu_custom_call.1
= control target key start
LH: loop header
LB: loop body
LE: loop exit
PB: predicated region body
PF: predicated region fallthrough
CT: control target
= control target key end

     0   :  { %s3711_s0 = inlined_call_operand.hbm [shape: bf16[48,768], index: 0, kind: input, shape index: {}]   ;;  %s3712_s1 = inlined_call_operand.hbm [shape: bf16[48,768], index: 1, kind: input, shape index: {}]   ;;  %s3713_s2 = inlined_call_operand.hbm [shape: bf16[768,128], index: 2, kind: input, shape index: {}]   ;;  %s3714_s3 = inlined_call_operand.vmem [shape: f32[1,128], index: 3, kind: input, shape index: {}]   ;;  %s3715_s4 = inlined_call_operand.hbm [shape: bf16[768,128], index: 4, kind: input, shape index: {}]   ;;  %s3716_s5 = inlined_call_operand.vmem [shape: f32[1,128], index: 5, kind: input, shape index: {}]   ;;  %s3717_s6 = inlined_call_operand.hbm [shape: bf16[128,768], index: 6, kind: input, shape index: {}]   ;;  %s3718_s7 = inlined_call_operand.vmem [shape: f32[1,768], index: 7, kind: input, shape index: {}]   ;;  %s3719_s8 = inlined_call_operand.vmem [shape: f32[48,1], index: 8, kind: output, shape index: {0}]   ;;  %s3720_s9 = inlined_call_operand.hbm [shape: bf16[48,768], index: 9, kind: output, shape index: {1}]   ;;  %s3721_s10 = inlined_call_operand.hbm [shape: bf16[48,768], index: 10, kind: output, shape index: {2}]  }
   0x1   :  { %3733 = sst [smem:[#allocation23_spill]] %s3711_s0 }
   0x2   :  { %3734 = sst [smem:[#allocation24_spill]] %s3713_s2 }
   0x3   :  { %3735 = sst [smem:[#allocation25_spill]] %s3715_s4 }
   0x4   :  { %3736 = sst [smem:[#allocation26_spill]] %s3717_s6 }
   0x5   :  { %16 = vsyncpa [#allocation3], 0 }
   0x6   :  { %18 = vsyncpa [#allocation3 + $0x1], 0 }
   0x7   :  { %19 = vsyncpa [#allocation6], 0 }
   0x8   :  { %21 = vsyncpa [#allocation6 + $0x1], 0 }
   0x9   :  { %22 = vsyncpa [#allocation9], 0 }
   0xa   :  { %23 = vsyncpa [#allocation4], 0 }
   0xb   :  { %25 = vsyncpa [#allocation4 + $0x1], 0 }
   0xc   :  { %26 = vsyncpa [#allocation13], 0 }
   0xd   :  { %28 = vsyncpa [#allocation13 + $0x1], 0  ;;  %s3347_s13 = smov 0   ;;  %s3349_s14 = smov 0  }
   0xe   :  { %s3351_s15 = smov 0   ;;  %s3353_s16 = smov 0  }
   0xf LB: > { %3737 = sst [smem:[#allocation20_spill]] %s3272_s15  ;;  %s3368_s17 = sadd.s32 4294967295, %s3276_s16   ;;  %s3276_s16 = sphi %s3353_s16, %s3762_s16   ;;  %s3272_s15 = sphi %s3351_s15, %s3764_s15   ;;  %s3268_s14 = sphi %s3349_s14, %s3766_s14   ;;  %s3264_s13 = sphi %s3347_s13, %s3765_s13  }
  0x10   : > { %s2393_s18 = sadd.s32 4294967294, %s3276_s16   ;;  %p54_p0 = scmp.ne.s32.totalorder %s3268_s14, %s3264_s13 }
  0x11   : > { %p3722_p1 = scmp.eq.s32.totalorder %s3368_s17, 0  ;;  %p262_p3 = scmp.eq.s32.totalorder %s2393_s18, 2 }
  0x12   : > { %p2394_p5 = scmp.ge.s32.totalorder %s3276_s16, 1  ;;  %p295_p7 = scmp.lt.s32.totalorder %s3276_s16, 4 }
  0x13   : > { %p3377_p4 = por %p3722_p1, %p54_p0  ;;  %p3382_p6 = por %p262_p3, %p54_p0 }
  0x14   : > { %p3387_p8 = pnand %p2394_p5, %p295_p7  ;;  %s3278_s22 = smov [#allocation7]  }
  0x15   : > { %s3738_s19 = scalar_select %p3377_p4, 1, 0 }
  0x16   : > { %s3739_s20 = scalar_select %p3382_p6, 1, 0 }
  0x17   : > { %s307_s23 = sshll.u32 %s3278_s22, 4  ;;  %p2776_p9 = pneg %p3387_p8  ;;  %s308_s23 = int_to_ptr.vmem [resolvable:$true] %s307_s23 }
  0x18   : > { %s3279_s25 = smov [#allocation8]   ;;  %s3280_s27 = smov [#allocation10]  }
  0x19   : > { %p3395_p10 = pnand %p2776_p9, %p3722_p1  ;;  %s323_s26 = sshll.u32 %s3279_s25, 4  ;;  %s324_s26 = int_to_ptr.vmem [resolvable:$true] %s323_s26 }
  0x1a   : > { %s339_s28 = sshll.u32 %s3280_s27, 4  ;;  %s3047_s29 = scalar_lea.vmem %s308_s23, 6144  ;;  %s340_s28 = int_to_ptr.vmem [resolvable:$true] %s339_s28 }
  0x1b   : > { %p3038_p11 = pneg %p3395_p10  ;;  %p3048_p12 = scmp.ne.s32.totalorder %s308_s23, %s3047_s29 }
  0x1c   : > { %p3055_p3 = scmp.lt.s32.totalorder %s308_s23, %s308_s23  ;;  %p3056_p5 = scmp.lt.s32.totalorder %s3047_s29, %s3047_s29 }
  0x1d   : > { %p3050_p13 = pnand %p3048_p12, %p3038_p11 }
  0x1e   : > { %p3057_p7 = por %p3056_p5, %p3055_p3 }
  0x1f   : > { %p3051_p0 = pneg %p3050_p13 }
  0x21   : > { %p3058_p9 = pnand %p3057_p7, %p3051_p0 }
  0x23   : > { %3061 = shalt.err (!%p3058_p9)
}
  0x24   : > { %s3281_s30 = smov 64   ;;  %s3282_s11 = smov 4  }
  0x25   : > { %s3742_s2 = sld [smem:[#allocation24_spill]]  ;;  %s3073_s22 = scalar_lea.vmem %s324_s26, 6144 }
  0x26   : > { %p3074_p1 = scmp.ne.s32.totalorder %s324_s26, %s3073_s22  ;;  %p3081_p2 = scmp.lt.s32.totalorder %s324_s26, %s324_s26 }
  0x27   : > { %p3082_p6 = scmp.lt.s32.totalorder %s3073_s22, %s3073_s22 }
  0x28   : > { %p3076_p12 = pnand %p3074_p1, %p3038_p11 }
  0x29   : > { %p3083_p3 = por %p3082_p6, %p3081_p2 }
  0x2a   : > { %p3077_p13 = pneg %p3076_p12 }
  0x2b   : > { %2779 = dma.hbm_to_vmem [thread:$0]  (!%p3395_p10), %s3742_s2, 6144, %s308_s23, [#allocation6], %s3281_s30, %s3281_s30, %s3282_s11  }
  0x2c   : > { %p3084_p0 = pnand %p3083_p3, %p3077_p13 }
  0x2e   : > { %3087 = shalt.err (!%p3084_p0)
}
  0x2f   : > { %s3743_s4 = sld [smem:[#allocation25_spill]]  ;;  %s3099_s23 = scalar_lea.vmem %s340_s28, 6144 }
  0x30   : > { %p3100_p5 = scmp.ne.s32.totalorder %s340_s28, %s3099_s23  ;;  %p3107_p9 = scmp.lt.s32.totalorder %s340_s28, %s340_s28 }
  0x31   : > { %p3108_p12 = scmp.lt.s32.totalorder %s3099_s23, %s3099_s23 }
  0x32   : > { %p3102_p7 = pnand %p3100_p5, %p3038_p11 }
  0x33   : > { %p3109_p4 = por %p3108_p12, %p3107_p9 }
  0x34   : > { %p3103_p1 = pneg %p3102_p7 }
  0x35   : > { %2782 = dma.hbm_to_vmem [thread:$0]  (!%p3395_p10), %s3743_s4, 6144, %s324_s26, [#allocation9], %s3281_s30, %s3281_s30, %s3282_s11  }
  0x36   : > { %p3110_p2 = pnand %p3109_p4, %p3103_p1 }
  0x38   : > { %3113 = shalt.err (!%p3110_p2)
}
  0x39   : > { %s3724_s29 = smov 384   ;;  %s3726_s26 = smov 24  }
  0x3a   : > { %s3744_s6 = sld [smem:[#allocation26_spill]]  ;;  %s3429_s12 = sadd.s32 1, %s3276_s16  }
  0x3b   : > { %3745 = sst [smem:[#allocation21_spill]] %s3429_s12  ;;  %s38_s18 = ssub.s32 %s3276_s16, %s3429_s12 }
  0x3c   : > { %s41_s22 = sadd.s32 1, %s3272_s15  ;;  %p39_p4 = scmp.eq.s32.totalorder %s38_s18, 0 }
  0x3d   : > { %p48_p6 = scmp.ne.s32.totalorder %s3272_s15, %s3268_s14  ;;  %p49_p11 = scmp.eq.s32.totalorder %s3276_s16, 0 }
  0x3e   : > { %p2803_p13 = scmp.lt.s32.totalorder %s3276_s16, 3  ;;  %p3747_p0 = scmp.eq.s32.totalorder %s3368_s17, 2 }
  0x3f   : > { %s3439_s25 = scalar_select %p39_p4, %s3272_s15, %s41_s22  }
  0x40   : > { %2785 = dma.hbm_to_vmem [thread:$0]  (!%p3395_p10), %s3744_s6, 6144, %s340_s28, [#allocation9], %s3724_s29, %s3724_s29, %s3726_s26  }
  0x41   : > { %3746 = sst [smem:[#allocation22_spill]] %s3439_s25  ;;  %p50_p3 = por %p49_p11, %p48_p6 }
  0x42   : > { %p3443_p5 = por %p3747_p0, %p48_p6  ;;  %s356_s27 = sand.u32 1, %s3272_s15  }
  0x43   : > { %s3728_s28 = smul.u32 768, %s3276_s16  ;;  %s3749_s0 = sld [smem:[#allocation23_spill]] }
  0x44   : > { %s3748_s24 = scalar_select %p3443_p5, 1, 0 }
  0x45   : > { %s3449_s23 = smul.u32 48, %s356_s27  ;;  %p3458_p10 = pnand %p2803_p13, %p50_p3 }
  0x46   : > { %s3466_s4 = scalar_lea.sflag [#allocation3], %s356_s27 }
  0x47   : > { %s360_s26 = scalar_lea.vmem [#allocation2], %s3449_s23  ;;  %p3116_p1 = pneg %p3458_p10 }
  0x48   : > { %s368_s2 = sshll.u32 %s360_s26, 4  ;;  %s3464_s2 = int_to_ptr.vmem [resolvable:$true] %s368_s2 }
  0x49   : > { %s3456_s18 = scalar_lea.hbm %s3749_s0, %s3728_s28  ;;  %s3119_s6 = scalar_lea.hbm %s3749_s0, 2304 }
  0x4a   : > { %s3114_s30 = scalar_lea.hbm %s3456_s18, 768  ;;  %p3120_p2 = scmp.lt.s32.totalorder %s3456_s18, %s3749_s0 }
  0x4b   : > { %p3115_p7 = scmp.ne.s32.totalorder %s3456_s18, %s3114_s30  ;;  %p3121_p4 = scmp.lt.s32.totalorder %s3119_s6, %s3114_s30 }
  0x4d   : > { %p3117_p9 = pnand %p3116_p1, %p3115_p7  ;;  %p3122_p6 = por %p3121_p4, %p3120_p2 }
  0x4f   : > { %p3118_p12 = pneg %p3117_p9 }
  0x51   : > { %p3123_p11 = pnand %p3122_p6, %p3118_p12 }
  0x53   : > { %3126 = shalt.err (!%p3123_p11)
}
  0x54   : > { %s3127_s26 = scalar_lea.vmem %s3464_s2, 768  ;;  %s3285_s27 = smov [#allocation2]  }
  0x55   : > { %p3128_p13 = scmp.ne.s32.totalorder %s3464_s2, %s3127_s26  ;;  %s3132_s28 = sshll.u32 %s3285_s27, 4  ;;  %s3133_s28 = int_to_ptr.vmem [resolvable:$false] %s3132_s28 }
  0x56   : > { %s3134_s11 = scalar_lea.vmem %s3133_s28, 1536  ;;  %p3135_p7 = scmp.lt.s32.totalorder %s3464_s2, %s3133_s28 }
  0x57   : > { %p3130_p3 = pnand %p3128_p13, %p3116_p1  ;;  %p3136_p9 = scmp.lt.s32.totalorder %s3134_s11, %s3127_s26 }
  0x59   : > { %p3131_p0 = pneg %p3130_p3  ;;  %p3137_p5 = por %p3136_p9, %p3135_p7 }
  0x5b   : > { %p3138_p2 = pnand %p3137_p5, %p3131_p0 }
  0x5d   : > { %3141 = shalt.err (!%p3138_p2)
}
  0x5e   : > { %s3751_s6 = smov 24   ;;  %s3752_s29 = smov 384  }
  0x5f   : > { %2789 = dma.hbm_to_vmem [thread:$0]  (!%p3458_p10), %s3456_s18, 768, %s3464_s2, %s3466_s4, %s3752_s29, %s3752_s29, %s3751_s6  }
  0x60   : > { %s3753_s25 = smul.u32 768, %s3276_s16  ;;  %s382_s28 = scalar_lea.vmem [#allocation5], %s3449_s23 }
  0x61   : > { %s390_s11 = sshll.u32 %s382_s28, 4  ;;  %s3754_s0 = sand.u32 1, %s3276_s16   ;;  %s3504_s11 = int_to_ptr.vmem [resolvable:$true] %s390_s11 }
  0x62   : > { %s3501_s26 = scalar_lea.hbm %s3712_s1, %s3753_s25  ;;  %s379_s15 = scalar_lea.sflag [#allocation6], %s3754_s0 }
  0x63   : > { %s3142_s12 = scalar_lea.hbm %s3501_s26, 768  ;;  %s3147_s18 = scalar_lea.hbm %s3712_s1, 2304 }
  0x64   : > { %p3143_p5 = scmp.ne.s32.totalorder %s3501_s26, %s3142_s12  ;;  %p3148_p6 = scmp.lt.s32.totalorder %s3501_s26, %s3712_s1 }
  0x65   : > { %p3149_p11 = scmp.lt.s32.totalorder %s3147_s18, %s3142_s12 }
  0x66   : > { %p3145_p12 = pnand %p3143_p5, %p3116_p1 }
  0x67   : > { %p3150_p13 = por %p3149_p11, %p3148_p6 }
  0x68   : > { %p3146_p4 = pneg %p3145_p12 }
  0x6a   : > { %p3151_p3 = pnand %p3150_p13, %p3146_p4 }
  0x6c   : > { %3154 = shalt.err (!%p3151_p3)
}
  0x6d   : > { %s3155_s0 = scalar_lea.vmem %s3504_s11, 768  ;;  %s3286_s23 = smov [#allocation5]  }
  0x6e   : > { %p3156_p0 = scmp.ne.s32.totalorder %s3504_s11, %s3155_s0  ;;  %s3160_s27 = sshll.u32 %s3286_s23, 4  ;;  %s3161_s27 = int_to_ptr.vmem [resolvable:$false] %s3160_s27 }
  0x6f   : > { %s3162_s28 = scalar_lea.vmem %s3161_s27, 1536  ;;  %p3163_p2 = scmp.lt.s32.totalorder %s3504_s11, %s3161_s27 }
  0x70   : > { %p3158_p7 = pnand %p3156_p0, %p3116_p1  ;;  %p3164_p5 = scmp.lt.s32.totalorder %s3162_s28, %s3155_s0 }
  0x72   : > { %p3159_p9 = pneg %p3158_p7  ;;  %p3165_p12 = por %p3164_p5, %p3163_p2 }
  0x74   : > { %p3166_p6 = pnand %p3165_p12, %p3159_p9 }
  0x76   : > { %3169 = shalt.err (!%p3166_p6)
}
  0x77   : > { %2792 = dma.hbm_to_vmem [thread:$0]  (!%p3458_p10), %s3501_s26, 768, %s3504_s11, %s379_s15, %s3752_s29, %s3752_s29, %s3751_s6  }
  0x78   : > { %402 = sbr.rel (%p3387_p8) target bundleno = 687 (0x2af), region = 52  ;;  %s3536_s12 = sand.u32 (!%p3387_p8), 1, %s3268_s14  }
  0x79   : > { %s3539_s2 = smul.u32 (!%p3387_p8), 48, %s3536_s12  ;;  %s405_s4 = scalar_lea.sflag (!%p3387_p8), [#allocation3], %s3536_s12 }
  0x7a   : > { %p3755_p1 = scmp.ne.s32.totalorder (!%p3387_p8), %s3738_s19, 0 }
  0x7b   : > { %s3543_s22 = scalar_lea.vmem (!%p3387_p8), [#allocation2], %s3539_s2 }
  0x7d   : > { %3239 = dma.done.wait (%p3755_p1), %s405_s4, 768  }
  0x7e   : > { %3241 = vsyncadd (%p3755_p1), %s405_s4, 4294966528  ;;  %s413_s15 = sand.u32 1, %s3368_s17   ;;  %s3551_s6 = scalar_lea.vmem [#allocation5], %s3539_s2 }
  0x7f   : > { %s414_s21 = scalar_lea.sflag [#allocation6], %s413_s15 }
  0x80   : > { %3243 = dma.done.wait (%p3755_p1), %s414_s21, 768  }
  0x81   : > { %3245 = vsyncadd (%p3755_p1), %s414_s21, 4294966528  ;;  %p3756_p8 = scmp.eq.s32.totalorder %s3368_s17, 0 }
  0x83   : > { %3247 = dma.done.wait (%p3756_p8), [#allocation6], 6144   ;;  %p3757_p10 = pmov %p3756_p8 }
  0x84   : > { %p3758_p4 = pmov %p3756_p8 }
  0x85   : > { %3249 = vsyncadd (%p3757_p10), [#allocation6], 4294961152 }
  0x86   : > { %3251 = dma.done.wait (%p3758_p4), [#allocation9], 12288   ;;  %p3759_p11 = pmov %p3758_p4 }
  0x87   : > { %v2850_v0 = vld [vmem:[#allocation7 + $0x78] sm:$0xff]   ;;  %v2854_v4 = vld [vmem:[#allocation7 + $0x70] sm:$0xff]   ;;  %v2858_v8 = vld [vmem:[#allocation7 + $0x68] sm:$0xff]   ;;  %s2409_s18 = sshll.u32 %s3368_s17, 1  ;;  %vm1598_vm0 = vcmask 7168   ;;  %s3610_s4 = scalar_lea.vmem [#allocation11], %s3539_s2 }
  0x88   : > { %3253 = vsyncadd (%p3759_p11), [#allocation9], 4294955008  ;;  %v2851_v1 = vld [vmem:[#allocation7 + $0xf8] sm:$0xff]   ;;  %2601 = vmatprep.subr.bf16.mxu0 %v2850_v0  ;;  %v2855_v5 = vld [vmem:[#allocation7 + $0xf0] sm:$0xff]   ;;  %p484_p13 = scmp.lt.s32.totalorder %s2409_s18, 5  ;;  %s2754_s21 = smul.u32 768, %s3368_s17 }
  0x89   : > { %v2852_v2 = vld [vmem:[#allocation7 + $0x38] sm:$0xff]   ;;  %2623 = vmatprep.subr.bf16.mxu1 %v2851_v1  ;;  %v2856_v6 = vld [vmem:[#allocation7 + $0x30] sm:$0xff]   ;;  %v2859_v9 = vld [vmem:[#allocation7 + $0xe8] sm:$0xff]   ;;  %p3760_p0 = scmp.ne.s32.totalorder %s3748_s24, 0  ;;  %s3288_s30 = smov [#allocation11]  }
  0x8a   : > { %v2853_v3 = vld [vmem:[#allocation7 + $0xb8] sm:$0xff]   ;;  %2602 = vmatpush3.bf16.msra.mxu0 %v2852_v2  ;;  %v2857_v7 = vld [vmem:[#allocation7 + $0xb0] sm:$0xff]   ;;  %v2860_v10 = vld [vmem:[#allocation7 + $0x28] sm:$0xff]   ;;  %s3768_s18 = smov (!%p484_p13, %s2409_s18), 5  ;;  %s3635_s19 = scalar_lea.hbm %s3720_s9, %s2754_s21 }
  0x8b   : > { %2624 = vmatpush3.bf16.msra.mxu1 %v2853_v3  ;;  %2603 = vmatprep.subr.bf16.mxu0 %v2854_v4  ;;  %v2861_v11 = vld [vmem:[#allocation7 + $0xa8] sm:$0xff]   ;;  %v2862_v12 = vld [vmem:[#allocation7 + $0x60] sm:$0xff]   ;;  %v2866_v16 = vld [vmem:[#allocation7 + $0x58] sm:$0xff]   ;;  %s2410_s25 = sshll.u32 %s3768_s18, 3  ;;  %s3640_s11 = scalar_lea.hbm %s3721_s10, %s2754_s21 }
  0x8c   : > { %2625 = vmatprep.subr.bf16.mxu1 %v2855_v5  ;;  %v2863_v13 = vld [vmem:[#allocation7 + $0xe0] sm:$0xff]   ;;  %v2867_v17 = vld [vmem:[#allocation7 + $0xd8] sm:$0xff]   ;;  %v2870_v20 = vld [vmem:[#allocation7 + $0x50] sm:$0xff]   ;;  %s487_s23 = scalar_lea.vmem %s3719_s8, %s2410_s25  ;;  %s2172_s18 = scalar_lea.sflag [#allocation4], %s3536_s12 }
  0x8d   : > { %v2864_v14 = vld [vmem:[#allocation7 + $0x20] sm:$0xff]   ;;  %v2868_v18 = vld [vmem:[#allocation7 + $0x18] sm:$0xff]   ;;  %v2871_v21 = vld [vmem:[#allocation7 + $0xd0] sm:$0xff]   ;;  %s3174_s0 = sshll.u32 %s3288_s30, 4  ;;  %s3175_s0 = int_to_ptr.vmem [resolvable:$false] %s3174_s0 }
  0x8e   : > { %2604 = vmatpush3.bf16.msra.mxu0 %v2856_v6  ;;  %v2865_v15 = vld [vmem:[#allocation7 + $0xa0] sm:$0xff]   ;;  %v2869_v19 = vld [vmem:[#allocation7 + $0x98] sm:$0xff]   ;;  %v2872_v22 = vld [vmem:[#allocation7 + $0x10] sm:$0xff]  }
  0x8f   : > { %2626 = vmatpush3.bf16.msra.mxu1 %v2857_v7  ;;  %2605 = vmatprep.subr.bf16.mxu0 %v2858_v8  ;;  %v2873_v23 = vld [vmem:[#allocation7 + $0x90] sm:$0xff]   ;;  %v2874_v24 = vld [vmem:[#allocation7 + $0x48] sm:$0xff]   ;;  %v2878_v28 = vld [vmem:[#allocation7 + $0x40] sm:$0xff]  }
  0x90   : > { %2627 = vmatprep.subr.bf16.mxu1 %v2859_v9  ;;  %v2875_v25 = vld [vmem:[#allocation7 + $0xc8] sm:$0xff]   ;;  %v2879_v29 = vld [vmem:[#allocation7 + $0xc0] sm:$0xff]   ;;  %v2888_v36 = vld [vmem:[#allocation7 + $0x178] sm:$0xff]  }
  0x91   : > { %v2876_v26 = vld [vmem:[#allocation7 + $0x8] sm:$0xff]   ;;  %v2880_v30 = vld [vmem:[#allocation7] sm:$0xff]   ;;  %v2889_v37 = vld [vmem:[#allocation8 + $0x78] sm:$0xff]  }
  0x92   : > { %2606 = vmatpush3.bf16.msra.mxu0 %v2860_v10  ;;  %v2877_v27 = vld [vmem:[#allocation7 + $0x88] sm:$0xff]   ;;  %v2881_v31 = vld [vmem:[#allocation7 + $0x80] sm:$0xff]   ;;  %v2890_v38 = vld [vmem:[#allocation7 + $0x138] sm:$0xff]  }
  0x93   : > { %2628 = vmatpush3.bf16.msra.mxu1 %v2861_v11  ;;  %2607 = vmatprep.subr.bf16.mxu0 %v2862_v12  ;;  %v2882_v32 = vld [vmem:[%s3543_s22] ss:$24 sps:$4 sm:$0xff]   ;;  %v2884_v33 = vld [vmem:[%s3543_s22 + $0x4] ss:$24 sps:$4 sm:$0xff]   ;;  %v2920_v4 = vld [vmem:[%s3543_s22 + $0x10] ss:$24 sps:$4 sm:$0xff]  }
  0x94   : > { %2629 = vmatprep.subr.bf16.mxu1 %v2863_v13  ;;  %v2885_v34 = vld [vmem:[%s3543_s22 + $0x8] ss:$24 sps:$4 sm:$0xff]   ;;  %v2887_v35 = vld [vmem:[%s3543_s22 + $0xc] ss:$24 sps:$4 sm:$0xff]   ;;  %951 = vmatprep.mubr.bf16.mxu0 %v2884_v33 }
  0x95   : > { %992 = vmatprep.mubr.bf16.mxu1 %v2887_v35  ;;  %v2891_v39 = vld [vmem:[#allocation8 + $0x38] sm:$0xff]   ;;  %v2892_v40 = vld [vmem:[#allocation7 + $0x170] sm:$0xff]   ;;  %v2896_v44 = vld [vmem:[#allocation7 + $0x168] sm:$0xff]  }
  0x96   : > { %2608 = vmatpush3.bf16.msra.mxu0 %v2864_v14  ;;  %v2893_v41 = vld [vmem:[#allocation8 + $0x70] sm:$0xff]   ;;  %v2897_v45 = vld [vmem:[#allocation8 + $0x68] sm:$0xff]   ;;  %v2900_v48 = vld [vmem:[#allocation7 + $0x160] sm:$0xff]  }
  0x97   : > { %2630 = vmatpush3.bf16.msra.mxu1 %v2865_v15  ;;  %2609 = vmatprep.subr.bf16.mxu0 %v2866_v16  ;;  %v2894_v42 = vld [vmem:[#allocation7 + $0x130] sm:$0xff]   ;;  %v2898_v46 = vld [vmem:[#allocation7 + $0x128] sm:$0xff]   ;;  %v2901_v49 = vld [vmem:[#allocation8 + $0x60] sm:$0xff]  }
  0x98   : > { %2631 = vmatprep.subr.bf16.mxu1 %v2867_v17  ;;  %v2895_v43 = vld [vmem:[#allocation8 + $0x30] sm:$0xff]   ;;  %v2899_v47 = vld [vmem:[#allocation8 + $0x28] sm:$0xff]   ;;  %v2902_v50 = vld [vmem:[#allocation7 + $0x120] sm:$0xff]  }
  0x99   : > { %v2903_v51 = vld [vmem:[#allocation8 + $0x20] sm:$0xff]   ;;  %v2904_v52 = vld [vmem:[#allocation7 + $0x158] sm:$0xff]   ;;  %v2908_v56 = vld [vmem:[#allocation7 + $0x150] sm:$0xff]  }
  0x9a   : > { %2610 = vmatpush3.bf16.msra.mxu0 %v2868_v18  ;;  %v2905_v53 = vld [vmem:[#allocation8 + $0x58] sm:$0xff]   ;;  %v2909_v57 = vld [vmem:[#allocation8 + $0x50] sm:$0xff]   ;;  %v2912_v60 = vld [vmem:[#allocation7 + $0x148] sm:$0xff]  }
  0x9b   : > { %2632 = vmatpush3.bf16.msra.mxu1 %v2869_v19  ;;  %2611 = vmatprep.subr.bf16.mxu0 %v2870_v20  ;;  %v2906_v54 = vld [vmem:[#allocation7 + $0x118] sm:$0xff]   ;;  %v2910_v58 = vld [vmem:[#allocation7 + $0x110] sm:$0xff]   ;;  %v2913_v61 = vld [vmem:[#allocation8 + $0x48] sm:$0xff]  }
  0x9c   : > { %2633 = vmatprep.subr.bf16.mxu1 %v2871_v21  ;;  %v2907_v55 = vld [vmem:[#allocation8 + $0x18] sm:$0xff]   ;;  %v2911_v59 = vld [vmem:[#allocation8 + $0x10] sm:$0xff]   ;;  %v2914_v62 = vld [vmem:[#allocation7 + $0x108] sm:$0xff]  }
  0x9d   : > { %v2915_v63 = vld [vmem:[#allocation8 + $0x8] sm:$0xff]   ;;  %v2916_v0 = vld [vmem:[#allocation7 + $0x140] sm:$0xff]   ;;  %v2926_v8 = vld [vmem:[#allocation8 + $0xf8] sm:$0xff]  }
  0x9e   : > { %2612 = vmatpush3.bf16.msra.mxu0 %v2872_v22  ;;  %v2917_v1 = vld [vmem:[#allocation8 + $0x40] sm:$0xff]   ;;  %v2927_v9 = vld [vmem:[#allocation8 + $0x178] sm:$0xff]   ;;  %v2930_v12 = vld [vmem:[#allocation8 + $0xf0] sm:$0xff]  }
  0x9f   : > { %2634 = vmatpush3.bf16.msra.mxu1 %v2873_v23  ;;  %2613 = vmatprep.subr.bf16.mxu0 %v2874_v24  ;;  %v2918_v2 = vld [vmem:[#allocation7 + $0x100] sm:$0xff]   ;;  %v2928_v10 = vld [vmem:[#allocation8 + $0xb8] sm:$0xff]   ;;  %v2931_v13 = vld [vmem:[#allocation8 + $0x170] sm:$0xff]  }
  0xa0   : > { %2635 = vmatprep.subr.bf16.mxu1 %v2875_v25  ;;  %v2919_v3 = vld [vmem:[#allocation8] sm:$0xff]   ;;  %v2929_v11 = vld [vmem:[#allocation8 + $0x138] sm:$0xff]   ;;  %v2932_v14 = vld [vmem:[#allocation8 + $0xb0] sm:$0xff]  }
  0xa1   : > { %v2922_v5 = vld [vmem:[%s3543_s22 + $0x14] ss:$24 sps:$4 sm:$0xff]   ;;  %v2923_v6 = vld [vmem:[%s3551_s6] ss:$24 sps:$4 sm:$0xff]   ;;  %v2925_v7 = vld [vmem:[%s3551_s6 + $0x4] ss:$24 sps:$4 sm:$0xff]  }
  0xa2   : > { %2614 = vmatpush3.bf16.msra.mxu0 %v2876_v26  ;;  %v2933_v15 = vld [vmem:[#allocation8 + $0x130] sm:$0xff]   ;;  %v2934_v16 = vld [vmem:[#allocation8 + $0xe8] sm:$0xff]   ;;  %v2938_v20 = vld [vmem:[#allocation8 + $0xe0] sm:$0xff]   ;;  %s3617_s22 = scalar_lea.vmem [#allocation12], %s3539_s2  ;;  %s2195_s2 = sshll.u32 %s3610_s4, 4  ;;  %s3626_s2 = int_to_ptr.vmem [resolvable:$true] %s2195_s2 }
  0xa3   : > { %2636 = vmatpush3.bf16.msra.mxu1 %v2877_v27  ;;  %2615 = vmatprep.subr.bf16.mxu0 %v2878_v28  ;;  %v2935_v17 = vld [vmem:[#allocation8 + $0x168] sm:$0xff]   ;;  %v2939_v21 = vld [vmem:[#allocation8 + $0x160] sm:$0xff]   ;;  %v2942_v24 = vld [vmem:[#allocation8 + $0xd8] sm:$0xff]   ;;  %s2212_s15 = sshll.u32 %s3617_s22, 4  ;;  %s3170_s25 = scalar_lea.vmem %s3626_s2, 768  ;;  %s3628_s15 = int_to_ptr.vmem [resolvable:$true] %s2212_s15 }
  0xa4   : > { %2637 = vmatprep.subr.bf16.mxu1 %v2879_v29  ;;  %v2936_v18 = vld [vmem:[#allocation8 + $0xa8] sm:$0xff]   ;;  %v2940_v22 = vld [vmem:[#allocation8 + $0xa0] sm:$0xff]   ;;  %v2943_v25 = vld [vmem:[#allocation8 + $0x158] sm:$0xff]   ;;  %p3171_p3 = scmp.ne.s32.totalorder %s3626_s2, %s3170_s25  ;;  %p3177_p2 = scmp.lt.s32.totalorder %s3626_s2, %s3175_s0 }
  0xa5   : > { %v2937_v19 = vld [vmem:[#allocation8 + $0x128] sm:$0xff]   ;;  %v2941_v23 = vld [vmem:[#allocation8 + $0x120] sm:$0xff]   ;;  %v2944_v26 = vld [vmem:[#allocation8 + $0x98] sm:$0xff]  }
  0xa6   : > { %2616 = vmatpush3.bf16.msra.mxu0 %v2880_v30  ;;  %v2945_v27 = vld [vmem:[#allocation8 + $0x118] sm:$0xff]   ;;  %v2946_v28 = vld [vmem:[#allocation8 + $0xd0] sm:$0xff]   ;;  %v2951_v33 = vld [vmem:[#allocation8 + $0x148] sm:$0xff]   ;;  %p3172_p7 = pnand %p3171_p3, %p3760_p0 }
  0xa7   : > { %2638 = vmatpush3.bf16.msra.mxu1 %v2881_v31  ;;  %2645 = vmatprep.subr.bf16.mxu0 %v2888_v36  ;;  %v2947_v29 = vld [vmem:[#allocation8 + $0x150] sm:$0xff]   ;;  %v2953_v35 = vld [vmem:[#allocation8 + $0x108] sm:$0xff]   ;;  %v2954_v36 = vld [vmem:[#allocation8 + $0xc0] sm:$0xff]  }
  0xa8   : > { %2667 = vmatprep.subr.bf16.mxu1 %v2889_v37  ;;  %v2948_v30 = vld [vmem:[#allocation8 + $0x90] sm:$0xff]   ;;  %v2955_v37 = vld [vmem:[#allocation8 + $0x140] sm:$0xff]   ;;  %p3173_p9 = pneg %p3172_p7 }
  0xa9   : > { %952 = vmatmul.mubr.bf16.vlgmr.msra.gmra.mxu0 %v2882_v32  ;;  %v2949_v31 = vld [vmem:[#allocation8 + $0x110] sm:$0xff]   ;;  %v2950_v32 = vld [vmem:[#allocation8 + $0xc8] sm:$0xff]  }
  0xaa   : > { %993 = vmatmul.mubr.bf16.vlgmr.msra.gmra.mxu1 %v2885_v34  ;;  %2646 = vmatpush3.bf16.msra.mxu0 %v2890_v38  ;;  %v2952_v34 = vld [vmem:[#allocation8 + $0x88] sm:$0xff]   ;;  %v2956_v38 = vld [vmem:[#allocation8 + $0x80] sm:$0xff]  }
  0xab   : > { %2668 = vmatpush3.bf16.msra.mxu1 %v2891_v39  ;;  %2647 = vmatprep.subr.bf16.mxu0 %v2892_v40  ;;  %v2957_v39 = vld [vmem:[#allocation8 + $0x100] sm:$0xff]  }
  0xac   : > { %2669 = vmatprep.subr.bf16.mxu1 %v2893_v41  ;;  %1033 = vmatprep.mubr.bf16.mxu0 %v2922_v5  ;;  %v2958_v40 = vld [vmem:[%s3551_s6 + $0x8] ss:$24 sps:$4 sm:$0xff]   ;;  %v2960_v41 = vld [vmem:[%s3551_s6 + $0xc] ss:$24 sps:$4 sm:$0xff]  }
  0xad   : > { %1501 = vmatprep.mubr.bf16.mxu1 %v2925_v7  ;;  %v3002_v5 = vld [vmem:[#allocation10 + $0x34] ss:$24 sps:$4 sm:$0xff]  }
  0xae   : > { %2648 = vmatpush3.bf16.msra.mxu0 %v2894_v42  ;;  %v2961_v42 = vld [vmem:[%s3551_s6 + $0x10] ss:$24 sps:$4 sm:$0xff]   ;;  %v3005_v7 = vld [vmem:[#allocation10 + $0x3c] ss:$24 sps:$4 sm:$0xff]  }
  0xaf   : > { %2670 = vmatpush3.bf16.msra.mxu1 %v2895_v43  ;;  %2649 = vmatprep.subr.bf16.mxu0 %v2896_v44  ;;  %v2963_v43 = vld [vmem:[%s3551_s6 + $0x14] ss:$24 sps:$4 sm:$0xff]   ;;  %v2964_v44 = vld [vmem:[#allocation10 + $0x150] ss:$24 sps:$4 sm:$0xff]  }
  0xb0   : > { %2671 = vmatprep.subr.bf16.mxu1 %v2897_v45  ;;  %v2966_v45 = vld [vmem:[#allocation10 + $0x154] ss:$24 sps:$4 sm:$0xff]  }
  0xb2   : > { %2650 = vmatpush3.bf16.msra.mxu0 %v2898_v46  ;;  %v2967_v46 = vld [vmem:[#allocation10 + $0x158] ss:$24 sps:$4 sm:$0xff]  }
  0xb3   : > { %2672 = vmatpush3.bf16.msra.mxu1 %v2899_v47  ;;  %2651 = vmatprep.subr.bf16.mxu0 %v2900_v48  ;;  %v2969_v47 = vld [vmem:[#allocation10 + $0x15c] ss:$24 sps:$4 sm:$0xff]  }
  0xb4   : > { %2673 = vmatprep.subr.bf16.mxu1 %v2901_v49  ;;  %v2972_v48 = vld [vmem:[#allocation10 + $0x124] ss:$24 sps:$4 sm:$0xff]  }
  0xb5   : > { %v2975_v49 = vld [vmem:[#allocation10 + $0x12c] ss:$24 sps:$4 sm:$0xff]  }
  0xb6   : > { %2652 = vmatpush3.bf16.msra.mxu0 %v2902_v50  ;;  %v2970_v50 = vld [vmem:[#allocation10 + $0x120] ss:$24 sps:$4 sm:$0xff]  }
  0xb7   : > { %2674 = vmatpush3.bf16.msra.mxu1 %v2903_v51  ;;  %2653 = vmatprep.subr.bf16.mxu0 %v2904_v52  ;;  %v2973_v51 = vld [vmem:[#allocation10 + $0x128] ss:$24 sps:$4 sm:$0xff]   ;;  %v2978_v52 = vld [vmem:[#allocation10 + $0xf4] ss:$24 sps:$4 sm:$0xff]  }
  0xb8   : > { %2675 = vmatprep.subr.bf16.mxu1 %v2905_v53  ;;  %v2976_v53 = vld [vmem:[#allocation10 + $0xf0] ss:$24 sps:$4 sm:$0xff]  }
  0xba   : > { %2654 = vmatpush3.bf16.msra.mxu0 %v2906_v54  ;;  %v2981_v54 = vld [vmem:[#allocation10 + $0xfc] ss:$24 sps:$4 sm:$0xff]  }
  0xbb   : > { %2676 = vmatpush3.bf16.msra.mxu1 %v2907_v55  ;;  %2655 = vmatprep.subr.bf16.mxu0 %v2908_v56  ;;  %v2979_v55 = vld [vmem:[#allocation10 + $0xf8] ss:$24 sps:$4 sm:$0xff]   ;;  %v2984_v56 = vld [vmem:[#allocation10 + $0xc4] ss:$24 sps:$4 sm:$0xff]  }
  0xbc   : > { %2677 = vmatprep.subr.bf16.mxu1 %v2909_v57  ;;  %v2987_v57 = vld [vmem:[#allocation10 + $0xcc] ss:$24 sps:$4 sm:$0xff]  }
  0xbe   : > { %2656 = vmatpush3.bf16.msra.mxu0 %v2910_v58  ;;  %v2982_v58 = vld [vmem:[#allocation10 + $0xc0] ss:$24 sps:$4 sm:$0xff]  }
  0xbf   : > { %2678 = vmatpush3.bf16.msra.mxu1 %v2911_v59  ;;  %2657 = vmatprep.subr.bf16.mxu0 %v2912_v60  ;;  %v2985_v59 = vld [vmem:[#allocation10 + $0xc8] ss:$24 sps:$4 sm:$0xff]   ;;  %v2990_v60 = vld [vmem:[#allocation10 + $0x94] ss:$24 sps:$4 sm:$0xff]  }
  0xc0   : > { %2679 = vmatprep.subr.bf16.mxu1 %v2913_v61  ;;  %v2993_v61 = vld [vmem:[#allocation10 + $0x9c] ss:$24 sps:$4 sm:$0xff]  }
  0xc2   : > { %2658 = vmatpush3.bf16.msra.mxu0 %v2914_v62  ;;  %v2988_v62 = vld [vmem:[#allocation10 + $0x90] ss:$24 sps:$4 sm:$0xff]  }
  0xc3   : > { %2680 = vmatpush3.bf16.msra.mxu1 %v2915_v63  ;;  %2659 = vmatprep.subr.bf16.mxu0 %v2916_v0  ;;  %v2991_v63 = vld [vmem:[#allocation10 + $0x98] ss:$24 sps:$4 sm:$0xff]  }
  0xc4   : > { %2681 = vmatprep.subr.bf16.mxu1 %v2917_v1  ;;  %v2994_v0 = vld [vmem:[#allocation10 + $0x60] ss:$24 sps:$4 sm:$0xff]   ;;  %v2996_v1 = vld [vmem:[#allocation10 + $0x64] ss:$24 sps:$4 sm:$0xff]  }
  0xc6   : > { %2660 = vmatpush3.bf16.msra.mxu0 %v2918_v2  ;;  %v2997_v2 = vld [vmem:[#allocation10 + $0x68] ss:$24 sps:$4 sm:$0xff]  }
  0xc7   : > { %2682 = vmatpush3.bf16.msra.mxu1 %v2919_v3  ;;  %2689 = vmatprep.subr.bf16.mxu0 %v2926_v8  ;;  %v2999_v3 = vld [vmem:[#allocation10 + $0x6c] ss:$24 sps:$4 sm:$0xff]   ;;  %v3006_v8 = vld [vmem:[#allocation10] ss:$24 sps:$4 sm:$0xff]  }
  0xc8   : > { %2711 = vmatprep.subr.bf16.mxu1 %v2927_v9  ;;  %v3008_v9 = vld [vmem:[#allocation10 + $0x4] ss:$24 sps:$4 sm:$0xff]  }
  0xc9   : > { %1034 = vmatmul.mubr.bf16.vlgmr.msra.gmra.mxu0 %v2920_v4  ;;  %v3000_v4 = vld [vmem:[#allocation10 + $0x30] ss:$24 sps:$4 sm:$0xff]  }
  0xca   : > { %1502 = vmatmul.mubr.bf16.vlgmr.msra.gmra.mxu1 %v2923_v6  ;;  %2690 = vmatpush3.bf16.msra.mxu0 %v2928_v10  ;;  %v3003_v6 = vld [vmem:[#allocation10 + $0x38] ss:$24 sps:$4 sm:$0xff]   ;;  %v3009_v10 = vld [vmem:[#allocation10 + $0x8] ss:$24 sps:$4 sm:$0xff]  }
  0xcb   : > { %2712 = vmatpush3.bf16.msra.mxu1 %v2929_v11  ;;  %2691 = vmatprep.subr.bf16.mxu0 %v2930_v12  ;;  %v3011_v11 = vld [vmem:[#allocation10 + $0xc] ss:$24 sps:$4 sm:$0xff]   ;;  %v3287_v12 = vmov 0  }
  0xcc   : > { %2713 = vmatprep.subr.bf16.mxu1 %v2931_v13  ;;  %1542 = vmatprep.mubr.bf16.mxu0 %v2960_v41  ;;  %v3014_v13 = vld [vmem:[#allocation10 + $0x164] ss:$24 sps:$4 sm:$0xff]   ;;  %v3017_v41 = vld [vmem:[#allocation10 + $0x134] ss:$24 sps:$4 sm:$0xff]  }
  0xcd   : > { %1583 = vmatprep.mubr.bf16.mxu1 %v2963_v43  ;;  %v3020_v43 = vld [vmem:[#allocation10 + $0x104] ss:$24 sps:$4 sm:$0xff]  }
  0xce   : > { %2692 = vmatpush3.bf16.msra.mxu0 %v2932_v14 }
  0xcf   : > { %2714 = vmatpush3.bf16.msra.mxu1 %v2933_v15  ;;  %2693 = vmatprep.subr.bf16.mxu0 %v2934_v16 }
  0xd0   : > { %2715 = vmatprep.subr.bf16.mxu1 %v2935_v17 }
  0xd2   : > { %2694 = vmatpush3.bf16.msra.mxu0 %v2936_v18 }
  0xd3   : > { %2716 = vmatpush3.bf16.msra.mxu1 %v2937_v19  ;;  %2695 = vmatprep.subr.bf16.mxu0 %v2938_v20 }
  0xd4   : > { %2717 = vmatprep.subr.bf16.mxu1 %v2939_v21 }
  0xd6   : > { %2696 = vmatpush3.bf16.msra.mxu0 %v2940_v22 }
  0xd7   : > { %2718 = vmatpush3.bf16.msra.mxu1 %v2941_v23  ;;  %2697 = vmatprep.subr.bf16.mxu0 %v2942_v24  ;;  %v2411_v23 = vld [vmem:[%s3714_s3] ss:$0 sm:$0xff] }
  0xd8   : > { %2719 = vmatprep.subr.bf16.mxu1 %v2943_v25 }
  0xda   : > { %2698 = vmatpush3.bf16.msra.mxu0 %v2944_v26 }
  0xdb   : > { %2720 = vmatpush3.bf16.msra.mxu1 %v2945_v27  ;;  %2699 = vmatprep.subr.bf16.mxu0 %v2946_v28 }
  0xdc   : > { %2721 = vmatprep.subr.bf16.mxu1 %v2947_v29 }
  0xde   : > { %2700 = vmatpush3.bf16.msra.mxu0 %v2948_v30 }
  0xdf   : > { %2722 = vmatpush3.bf16.msra.mxu1 %v2949_v31  ;;  %2701 = vmatprep.subr.bf16.mxu0 %v2950_v32 }
  0xe0   : > { %2723 = vmatprep.subr.bf16.mxu1 %v2951_v33 }
  0xe2   : > { %2702 = vmatpush3.bf16.msra.mxu0 %v2952_v34 }
  0xe3   : > { %2724 = vmatpush3.bf16.msra.mxu1 %v2953_v35  ;;  %2703 = vmatprep.subr.bf16.mxu0 %v2954_v36 }
  0xe4   : > { %2725 = vmatprep.subr.bf16.mxu1 %v2955_v37 }
  0xe6   : > { %2704 = vmatpush3.bf16.msra.mxu0 %v2956_v38 }
  0xe7   : > { %2726 = vmatpush3.bf16.msra.mxu1 %v2957_v39  ;;  %1923 = vmatprep.subr.bf16.mxu0 %v2966_v45  ;;  %v3012_v39 = vld [vmem:[#allocation10 + $0x160] ss:$24 sps:$4 sm:$0xff]   ;;  %v3023_v45 = vld [vmem:[#allocation10 + $0xd4] ss:$24 sps:$4 sm:$0xff]  }
  0xe8   : > { %1976 = vmatprep.subr.bf16.mxu1 %v2969_v47  ;;  %v3021_v47 = vld [vmem:[#allocation10 + $0xd0] ss:$24 sps:$4 sm:$0xff]  }
  0xe9   : > { %1543 = vmatmul.mubr.bf16.vlgmr.msra.gmra.mxu0 %v2958_v40 }
  0xea   : > { %1584 = vmatmul.mubr.bf16.vlgmr.msra.gmra.mxu1 %v2961_v42  ;;  %1924 = vmatpush1.bf16.msra.mxu0 %v2964_v44  ;;  %v3015_v42 = vld [vmem:[#allocation10 + $0x130] ss:$24 sps:$4 sm:$0xff]   ;;  %v3018_v44 = vld [vmem:[#allocation10 + $0x100] ss:$24 sps:$4 sm:$0xff]  }
  0xeb   : > { %1977 = vmatpush1.bf16.msra.mxu1 %v2967_v46  ;;  %1925 = vmatprep.subr.bf16.mxu0 %v2972_v48  ;;  %v3026_v48 = vld [vmem:[#allocation10 + $0xa4] ss:$24 sps:$4 sm:$0xff]  }
  0xec   : > { %1978 = vmatprep.subr.bf16.mxu1 %v2975_v49  ;;  %1955 = vmatprep.mubr.bf16.mxu0 %v3287_v12 }
  0xed   : > { %2008 = vmatprep.mubr.bf16.mxu1 %v3287_v12 }
  0xee   : > { %1926 = vmatpush1.bf16.msra.mxu0 %v2970_v50  ;;  %v3024_v50 = vld [vmem:[#allocation10 + $0xa0] ss:$24 sps:$4 sm:$0xff]  }
  0xef   : > { %1979 = vmatpush1.bf16.msra.mxu1 %v2973_v51  ;;  %1927 = vmatprep.subr.bf16.mxu0 %v2978_v52  ;;  %v3029_v51 = vld [vmem:[#allocation10 + $0x74] ss:$24 sps:$4 sm:$0xff]  }
  0xf0   : > { %1980 = vmatprep.subr.bf16.mxu1 %v2981_v54  ;;  %v3032_v54 = vld [vmem:[#allocation10 + $0x44] ss:$24 sps:$4 sm:$0xff]  }
  0xf2   : > { %1928 = vmatpush1.bf16.msra.mxu0 %v2976_v53  ;;  %v3027_v53 = vld [vmem:[#allocation10 + $0x70] ss:$24 sps:$4 sm:$0xff]  }
  0xf3   : > { %1981 = vmatpush1.bf16.msra.mxu1 %v2979_v55  ;;  %1929 = vmatprep.subr.bf16.mxu0 %v2984_v56 }
  0xf4   : > { %1982 = vmatprep.subr.bf16.mxu1 %v2987_v57  ;;  %v3030_v57 = vld [vmem:[#allocation10 + $0x40] ss:$24 sps:$4 sm:$0xff]  }
  0xf6   : > { %1930 = vmatpush1.bf16.msra.mxu0 %v2982_v58  ;;  %v2466_v58 = vld [vmem:[%s3716_s5] ss:$0 sm:$0xff] }
  0xf7   : > { %1983 = vmatpush1.bf16.msra.mxu1 %v2985_v59  ;;  %1931 = vmatprep.subr.bf16.mxu0 %v2990_v60  ;;  %v3035_v60 = vld [vmem:[#allocation10 + $0x14] ss:$24 sps:$4 sm:$0xff]  }
  0xf8   : > { %1984 = vmatprep.subr.bf16.mxu1 %v2993_v61 }
  0xfa   : > { %1932 = vmatpush1.bf16.msra.mxu0 %v2988_v62 }
  0xfb   : > { %1985 = vmatpush1.bf16.msra.mxu1 %v2991_v63  ;;  %1933 = vmatprep.subr.bf16.mxu0 %v2996_v1 }
  0xfc   : > { %1986 = vmatprep.subr.bf16.mxu1 %v2999_v3  ;;  %v3033_v3 = vld [vmem:[#allocation10 + $0x10] ss:$24 sps:$4 sm:$0xff]  }
  0xfe   : > { %1934 = vmatpush1.bf16.msra.mxu0 %v2994_v0 }
  0xff   : > { %1987 = vmatpush1.bf16.msra.mxu1 %v2997_v2  ;;  %1935 = vmatprep.subr.bf16.mxu0 %v3002_v5 }
 0x100   : > { %1988 = vmatprep.subr.bf16.mxu1 %v3005_v7 }
 0x102   : > { %1936 = vmatpush1.bf16.msra.mxu0 %v3000_v4 }
 0x103   : > { %1989 = vmatpush1.bf16.msra.mxu1 %v3003_v6  ;;  %1937 = vmatprep.subr.bf16.mxu0 %v3008_v9 }
 0x104   : > { %1990 = vmatprep.subr.bf16.mxu1 %v3011_v11 }
 0x106   : > { %1938 = vmatpush1.bf16.msra.mxu0 %v3006_v8 }
 0x107   : > { %1991 = vmatpush1.bf16.msra.mxu1 %v3009_v10  ;;  %2029 = vmatprep.subr.bf16.mxu0 %v3014_v13 }
 0x108   : > { %2733 = vmatprep.subr.bf16.mxu1 %v3014_v13 }
 0x169   : > { %v2617_v14 = vpop.f32.mrf.mxu0 }
 0x16a   : > { %v2639_v16 = vpop.f32.mrf.mxu1 }
 0x16b   : > { %v2618_v15 = vpop.f32.mrf.mxu0 }
 0x16c   : > { %v2640_v18 = vpop.f32.mrf.mxu1  ;;  %v2619_v21 = vadd.f32 %v2618_v15, %v2617_v14 }
 0x16d   : > { %v2620_v17 = vpop.f32.mrf.mxu0  ;;  %v2641_v28 = vadd.f32 %v2640_v18, %v2639_v16 }
 0x16e   : > { %v2642_v20 = vpop.f32.mrf.mxu1  ;;  %v954_v27 = vadd.f32 %v2619_v21, %v2411_v23 }
 0x16f   : > { %v2621_v19 = vpop.f32.mrf.mxu0 }
 0x170   : > { %v2622_v22 = vadd.f32 %v2621_v19, %v2620_v17  ;;  %v2643_v25 = vpop.f32.mrf.mxu1  ;;  %v995_v34 = vadd.f32 %v2641_v28, %v954_v27  ;;  %v1651_v27 = vld [vmem:[%s3718_s7] sm:$0x3f] }
 0x171   : > { %v2644_v31 = vadd.f32 %v2643_v25, %v2642_v20 }
 0x172   : > { %v957_v29 = vadd.f32 %v2622_v22, %v2411_v23  ;;  %v1653_v22 = vlaneseq }
 0x174   : > { %v998_v35 = vadd.f32 %v2644_v31, %v957_v29  ;;  %v1654_v23 = vshrl.u32 %v1653_v22, 7 }
 0x176   : > { %v1659_v25 = vsub.s32 1, %v1654_v23 }
 0x189   : > { %v2661_v24 = vpop.f32.mrf.mxu0 }
 0x18a   : > { %v2683_v46 = vpop.f32.mrf.mxu1 }
 0x18b   : > { %v2662_v26 = vpop.f32.mrf.mxu0 }
 0x18c   : > { %v2663_v32 = vadd.f32 %v2662_v26, %v2661_v24  ;;  %v2684_v49 = vpop.f32.mrf.mxu1  ;;  %v1655_v24 = vsub.s32 0, %v1654_v23  ;;  %v1667_v26 = vsub.s32 3, %v1654_v23 }
 0x18d   : > { %v2664_v30 = vpop.f32.mrf.mxu0  ;;  %v2685_v55 = vadd.f32 %v2684_v49, %v2683_v46 }
 0x18e   : > { %v3582_v37 = vadd.f32 %v2663_v32, %v995_v34  ;;  %v2686_v52 = vpop.f32.mrf.mxu1  ;;  %v1656_v28 = vrot.slane %v1651_v27, %v1655_v24  ;;  %v1668_v31 = vrot.slane %v1651_v27, %v1667_v26 }
 0x18f   : > { %v2665_v33 = vpop.f32.mrf.mxu0  ;;  %v1504_v63 = vadd.f32 %v2685_v55, %v2466_v58 }
 0x190   : > { %v2666_v36 = vadd.f32 %v2665_v33, %v2664_v30  ;;  %v2687_v56 = vpop.f32.mrf.mxu1  ;;  %v1660_v30 = vrot.slane %v1651_v27, %v1659_v25 }
 0x191   : > { %v2688_v0 = vadd.f32 %v2687_v56, %v2686_v52  ;;  %v1671_v56 = vsub.s32 4, %v1654_v23 }
 0x192   : > { %v3584_v38 = vadd.f32 %v2666_v36, %v998_v35 }
 0x193   : > { %v1507_v9 = vadd.f32 %v2688_v0, %v2466_v58 }
 0x194   : > { %v3588_v40 = vpack.c.bf16 %v3584_v38, %v3582_v37 }
 0x196   : > { %1956 = vmatmul.mubr.bf16.vlgmr.msra.gmra.mxu0 %v3588_v40  ;;  %2009 = vmatmul.mubr.bf16.vlgmr.msra.gmra.mxu1 %v3588_v40 }
 0x197   : > { %2030 = vmatpush1.bf16.msra.mxu0 %v3012_v39  ;;  %2741 = vmatpush1.bf16.msra.mxu1 %v3012_v39 }
 0x198   : > { %2031 = vmatprep.subr.bf16.mxu0 %v3017_v41  ;;  %2734 = vmatprep.subr.bf16.mxu1 %v3017_v41 }
 0x199   : > { %1965 = vmatprep.mubr.bf16.mxu0 %v3287_v12  ;;  %2018 = vmatprep.mubr.bf16.mxu1 %v3287_v12 }
 0x19b   : > { %2032 = vmatpush1.bf16.msra.mxu0 %v3015_v42  ;;  %2742 = vmatpush1.bf16.msra.mxu1 %v3015_v42 }
 0x19c   : > { %2033 = vmatprep.subr.bf16.mxu0 %v3020_v43  ;;  %2735 = vmatprep.subr.bf16.mxu1 %v3020_v43 }
 0x19f   : > { %2034 = vmatpush1.bf16.msra.mxu0 %v3018_v44  ;;  %2743 = vmatpush1.bf16.msra.mxu1 %v3018_v44 }
 0x1a0   : > { %2035 = vmatprep.subr.bf16.mxu0 %v3023_v45  ;;  %2736 = vmatprep.subr.bf16.mxu1 %v3023_v45 }
 0x1a3   : > { %2036 = vmatpush1.bf16.msra.mxu0 %v3021_v47  ;;  %2744 = vmatpush1.bf16.msra.mxu1 %v3021_v47 }
 0x1a4   : > { %2037 = vmatprep.subr.bf16.mxu0 %v3026_v48  ;;  %2737 = vmatprep.subr.bf16.mxu1 %v3026_v48 }
 0x1a7   : > { %2038 = vmatpush1.bf16.msra.mxu0 %v3024_v50  ;;  %2745 = vmatpush1.bf16.msra.mxu1 %v3024_v50 }
 0x1a8   : > { %2039 = vmatprep.subr.bf16.mxu0 %v3029_v51  ;;  %2738 = vmatprep.subr.bf16.mxu1 %v3029_v51 }
 0x1a9   : > { %v2705_v59 = vpop.f32.mrf.mxu0 }
 0x1aa   : > { %v2727_v61 = vpop.f32.mrf.mxu1 }
 0x1ab   : > { %2040 = vmatpush1.bf16.msra.mxu0 %v3027_v53  ;;  %2746 = vmatpush1.bf16.msra.mxu1 %v3027_v53  ;;  %v2706_v62 = vpop.f32.mrf.mxu0 }
 0x1ac   : > { %2041 = vmatprep.subr.bf16.mxu0 %v3032_v54  ;;  %2739 = vmatprep.subr.bf16.mxu1 %v3032_v54  ;;  %v2707_v1 = vadd.f32 %v2706_v62, %v2705_v59  ;;  %v2728_v2 = vpop.f32.mrf.mxu1 }
 0x1ad   : > { %v2708_v4 = vpop.f32.mrf.mxu0  ;;  %v2729_v6 = vadd.f32 %v2728_v2, %v2727_v61 }
 0x1ae   : > { %v1545_v5 = vadd.f32 %v2707_v1, %v1504_v63  ;;  %v2730_v7 = vpop.f32.mrf.mxu1 }
 0x1af   : > { %2042 = vmatpush1.bf16.msra.mxu0 %v3030_v57  ;;  %2747 = vmatpush1.bf16.msra.mxu1 %v3030_v57  ;;  %v2709_v8 = vpop.f32.mrf.mxu0  ;;  %v1675_v57 = vsub.s32 5, %v1654_v23 }
 0x1b0   : > { %2043 = vmatprep.subr.bf16.mxu0 %v3035_v60  ;;  %2740 = vmatprep.subr.bf16.mxu1 %v3035_v60  ;;  %v2710_v10 = vadd.f32 %v2709_v8, %v2708_v4  ;;  %v2731_v11 = vpop.f32.mrf.mxu1  ;;  %v1586_v13 = vadd.f32 %v2729_v6, %v1545_v5  ;;  %v1672_v4 = vrot.slane %v1651_v27, %v1671_v56 }
 0x1b1   : > { %v2732_v15 = vadd.f32 %v2731_v11, %v2730_v7  ;;  %v1676_v5 = vrot.slane %v1651_v27, %v1675_v57 }
 0x1b2   : > { %v1548_v14 = vadd.f32 %v2710_v10, %v1507_v9  ;;  %v1592_v16 = vmul.f32 %v1586_v13, %v3582_v37 }
 0x1b3   : > { %2044 = vmatpush1.bf16.msra.mxu0 %v3033_v3  ;;  %2748 = vmatpush1.bf16.msra.mxu1 %v3033_v3 }
 0x1b4   : > { %v1589_v17 = vadd.f32 %v2732_v15, %v1548_v14  ;;  %1594 = vadd.xlane.f32.xlu0 %v1592_v16 }
 0x1b6   : > { %v1602_v18 = vpack.c.bf16 %v1589_v17, %v1586_v13  ;;  %v1593_v19 = vmul.f32 %v1589_v17, %v3584_v38 }
 0x1b8   : > { %1966 = vmatmul.mubr.bf16.gmra.mxu0 %v1602_v18  ;;  %2019 = vmatmul.mubr.bf16.gmra.mxu1 %v1602_v18 }
 0x1b9   : > { %1596 = vadd.xlane.f32.xlu0 %v1593_v19  ;;  %2061 = vmatprep.mubr.bf16.mxu0 %v3287_v12 }
 0x1ba   : > { %2071 = vmatprep.mubr.bf16.mxu1 %v3287_v12  ;;  %v1663_v12 = vsub.s32 2, %v1654_v23 }
 0x1bc   : > { %v1664_v29 = vrot.slane %v1651_v27, %v1663_v12 }
 0x1c0   : > { %2062 = vmatmul.mubr.bf16.vlgmr.msra.gmra.mxu0 %v3588_v40  ;;  %2072 = vmatmul.mubr.bf16.vlgmr.msra.gmra.mxu1 %v1602_v18 }
 0x23d   : > { %v1595_v20 = vpop.xlane.xlu0 %1594 }
 0x23e   : > { %1599 = vst.msk [vmem:[%s487_s23] sm:$0xff] %vm1598_vm0, %v1595_v20 }
 0x242   : > { %v1597_v21 = vpop.xlane.xlu0 %1596 }
 0x243   : > { %1600 = vst.msk [vmem:[%s487_s23 + $0x8] sm:$0xff] %vm1598_vm0, %v1597_v21  ;;  %s3176_s23 = scalar_lea.vmem %s3175_s0, 1536 }
 0x244   : > { %p3178_p5 = scmp.lt.s32.totalorder %s3176_s23, %s3170_s25 }
 0x246   : > { %p3179_p12 = por %p3178_p5, %p3177_p2 }
 0x248   : > { %p3180_p6 = pnand %p3179_p12, %p3173_p9 }
 0x256   : > { %v1957_v32 = vpop.f32.mrf.mxu0  ;;  %v2010_v33 = vpop.f32.mrf.mxu1 }
 0x257   : > { %v1958_v36 = vadd.f32 %v1957_v32, %v1656_v28  ;;  %v2011_v37 = vadd.f32 %v2010_v33, %v1664_v29 }
 0x258   : > { %v1959_v34 = vpop.f32.mrf.mxu0  ;;  %v2012_v35 = vpop.f32.mrf.mxu1 }
 0x259   : > { %v1960_v38 = vadd.f32 %v1959_v34, %v1660_v30  ;;  %v2013_v39 = vadd.f32 %v2012_v35, %v1668_v31 }
 0x25a   : > { %v1961_v40 = vpop.f32.mrf.mxu0  ;;  %v2014_v41 = vpop.f32.mrf.mxu1 }
 0x25b   : > { %v2589_v42 = vpack.c.bf16 %v1960_v38, %v1958_v36  ;;  %v2590_v43 = vpack.c.bf16 %v2013_v39, %v2011_v37  ;;  %v1962_v46 = vadd.f32 %v1961_v40, %v1656_v28  ;;  %v2015_v47 = vadd.f32 %v2014_v41, %v1664_v29 }
 0x25c   : > { %v1963_v44 = vpop.f32.mrf.mxu0  ;;  %v2016_v45 = vpop.f32.mrf.mxu1 }
 0x25d   : > { %2118 = vst [vmem:[%s3610_s4] sm:$0xff] %v2589_v42  ;;  %2119 = vst [vmem:[%s3610_s4 + $0x8] sm:$0xff] %v2590_v43  ;;  %v1964_v48 = vadd.f32 %v1963_v44, %v1660_v30  ;;  %v2017_v49 = vadd.f32 %v2016_v45, %v1668_v31 }
 0x25f   : > { %v2592_v50 = vpack.c.bf16 %v1964_v48, %v1962_v46  ;;  %v2593_v51 = vpack.c.bf16 %v2017_v49, %v2015_v47 }
 0x261   : > { %2121 = vst [vmem:[%s3610_s4 + $0x18] sm:$0xff] %v2592_v50  ;;  %2122 = vst [vmem:[%s3610_s4 + $0x20] sm:$0xff] %v2593_v51 }
 0x278   : > { %v1967_v52 = vpop.f32.mrf.mxu0  ;;  %v2020_v53 = vpop.f32.mrf.mxu1 }
 0x279   : > { %v1968_v58 = vadd.f32 %v1967_v52, %v1656_v28  ;;  %v2021_v59 = vadd.f32 %v2020_v53, %v1664_v29 }
 0x27a   : > { %v1969_v54 = vpop.f32.mrf.mxu0  ;;  %v2022_v55 = vpop.f32.mrf.mxu1 }
 0x27b   : > { %v1970_v60 = vadd.f32 %v1969_v54, %v1660_v30  ;;  %v2023_v61 = vadd.f32 %v2022_v55, %v1668_v31 }
 0x27c   : > { %v1971_v62 = vpop.f32.mrf.mxu0  ;;  %v2024_v63 = vpop.f32.mrf.mxu1 }
 0x27d   : > { %v2595_v0 = vpack.c.bf16 %v1970_v60, %v1968_v58  ;;  %v2596_v1 = vpack.c.bf16 %v2023_v61, %v2021_v59  ;;  %v1972_v6 = vadd.f32 %v1971_v62, %v1656_v28  ;;  %v2025_v7 = vadd.f32 %v2024_v63, %v1664_v29 }
 0x27e   : > { %v1973_v2 = vpop.f32.mrf.mxu0  ;;  %v2026_v3 = vpop.f32.mrf.mxu1 }
 0x27f   : > { %2160 = vst [vmem:[%s3617_s22] sm:$0xff] %v2595_v0  ;;  %2161 = vst [vmem:[%s3617_s22 + $0x8] sm:$0xff] %v2596_v1  ;;  %v1974_v8 = vadd.f32 %v1973_v2, %v1660_v30  ;;  %v2027_v9 = vadd.f32 %v2026_v3, %v1668_v31 }
 0x280   : > { %v2063_v10 = vpop.f32.mrf.mxu0  ;;  %v2073_v11 = vpop.f32.mrf.mxu1 }
 0x281   : > { %v2598_v13 = vpack.c.bf16 %v1974_v8, %v1972_v6  ;;  %v2599_v14 = vpack.c.bf16 %v2027_v9, %v2025_v7  ;;  %v2064_v17 = vadd.f32 %v2063_v10, %v1672_v4  ;;  %v2074_v18 = vadd.f32 %v2073_v11, %v1672_v4 }
 0x282   : > { %v2065_v15 = vpop.f32.mrf.mxu0  ;;  %v2075_v16 = vpop.f32.mrf.mxu1 }
 0x283   : > { %2163 = vst [vmem:[%s3617_s22 + $0x18] sm:$0xff] %v2598_v13  ;;  %2164 = vst [vmem:[%s3617_s22 + $0x20] sm:$0xff] %v2599_v14  ;;  %v2066_v19 = vadd.f32 %v2065_v15, %v1676_v5  ;;  %v2076_v20 = vadd.f32 %v2075_v16, %v1676_v5 }
 0x284   : > { %v2067_v21 = vpop.f32.mrf.mxu0  ;;  %v2077_v22 = vpop.f32.mrf.mxu1 }
 0x285   : > { %v2591_v23 = vpack.c.bf16 %v2066_v19, %v2064_v17  ;;  %v2597_v24 = vpack.c.bf16 %v2076_v20, %v2074_v18  ;;  %v2068_v26 = vadd.f32 %v2067_v21, %v1672_v4  ;;  %v2078_v27 = vadd.f32 %v2077_v22, %v1672_v4 }
 0x286   : > { %v2069_v12 = vpop.f32.mrf.mxu0  ;;  %v2079_v25 = vpop.f32.mrf.mxu1 }
 0x287   : > { %2120 = vst [vmem:[%s3610_s4 + $0x10] sm:$0xff] %v2591_v23  ;;  %2162 = vst [vmem:[%s3617_s22 + $0x10] sm:$0xff] %v2597_v24  ;;  %v2070_v28 = vadd.f32 %v2069_v12, %v1676_v5  ;;  %v2080_v29 = vadd.f32 %v2079_v25, %v1676_v5 }
 0x289   : > { %v2594_v30 = vpack.c.bf16 %v2070_v28, %v2068_v26  ;;  %v2600_v31 = vpack.c.bf16 %v2080_v29, %v2078_v27 }
 0x28b   : > { %2123 = vst [vmem:[%s3610_s4 + $0x28] sm:$0xff] %v2594_v30  ;;  %2165 = vst [vmem:[%s3617_s22 + $0x28] sm:$0xff] %v2600_v31 }
 0x28c   : > { %3183 = shalt.err (!%p3180_p6)
}
 0x28d   : > { %s3184_s27 = scalar_lea.hbm %s3635_s19, 768  ;;  %s3188_s22 = scalar_lea.hbm %s3720_s9, 2304 }
 0x28e   : > { %p3185_p1 = scmp.ne.s32.totalorder %s3635_s19, %s3184_s27  ;;  %p3189_p4 = scmp.lt.s32.totalorder %s3635_s19, %s3720_s9 }
 0x28f   : > { %p3190_p11 = scmp.lt.s32.totalorder %s3188_s22, %s3184_s27 }
 0x290   : > { %p3186_p8 = pnand %p3185_p1, %p3760_p0 }
 0x291   : > { %p3191_p13 = por %p3190_p11, %p3189_p4 }
 0x292   : > { %p3187_p10 = pneg %p3186_p8 }
 0x294   : > { %p3192_p3 = pnand %p3191_p13, %p3187_p10 }
 0x296   : > { %3195 = shalt.err (!%p3192_p3)
}
 0x297   : > { %s3289_s6 = smov 384   ;;  %s3290_s29 = smov 24  }
 0x298   : > { %2772 = dma.vmem_to_hbm [thread:$0]  (%p3760_p0), %s3626_s2, 768, %s3635_s19, %s2172_s18, %s3289_s6, %s3289_s6, %s3290_s29  }
 0x299   : > { %s2177_s26 = scalar_lea.sflag [#allocation13], %s3536_s12  ;;  %s3196_s25 = scalar_lea.vmem %s3628_s15, 768 }
 0x29a   : > { %p3197_p7 = scmp.ne.s32.totalorder %s3628_s15, %s3196_s25  ;;  %s3291_s30 = smov [#allocation12]  }
 0x29b   : > { %s3200_s0 = sshll.u32 %s3291_s30, 4  ;;  %s3201_s0 = int_to_ptr.vmem [resolvable:$false] %s3200_s0 }
 0x29c   : > { %p3198_p9 = pnand %p3197_p7, %p3760_p0  ;;  %s3202_s23 = scalar_lea.vmem %s3201_s0, 1536 }
 0x29d   : > { %p3203_p5 = scmp.lt.s32.totalorder %s3628_s15, %s3201_s0  ;;  %p3204_p12 = scmp.lt.s32.totalorder %s3202_s23, %s3196_s25 }
 0x29e   : > { %p3199_p2 = pneg %p3198_p9 }
 0x29f   : > { %p3205_p6 = por %p3204_p12, %p3203_p5 }
 0x2a1   : > { %p3206_p1 = pnand %p3205_p6, %p3199_p2 }
 0x2a3   : > { %3209 = shalt.err (!%p3206_p1)
}
 0x2a4   : > { %s3210_s2 = scalar_lea.hbm %s3640_s11, 768  ;;  %s3214_s18 = scalar_lea.hbm %s3721_s10, 2304 }
 0x2a5   : > { %p3211_p8 = scmp.ne.s32.totalorder %s3640_s11, %s3210_s2  ;;  %p3215_p11 = scmp.lt.s32.totalorder %s3640_s11, %s3721_s10 }
 0x2a6   : > { %p3216_p13 = scmp.lt.s32.totalorder %s3214_s18, %s3210_s2 }
 0x2a7   : > { %p3212_p10 = pnand %p3211_p8, %p3760_p0 }
 0x2a8   : > { %p3217_p3 = por %p3216_p13, %p3215_p11 }
 0x2a9   : > { %p3213_p4 = pneg %p3212_p10 }
 0x2ab   : > { %p3218_p7 = pnand %p3217_p3, %p3213_p4 }
 0x2ad   : > { %3221 = shalt.err (!%p3218_p7)
}
 0x2ae   : > { %2773 = dma.vmem_to_hbm [thread:$0]  (%p3760_p0), %s3628_s15, 768, %s3640_s11, %s2177_s26, %s3289_s6, %s3289_s6, %s3290_s29  }
 0x2af PF: > { %p2807_p9 = scmp.ge.s32.totalorder %s3276_s16, 2  ;;  %s2235_s4 = sand.u32 1, %s3264_s13  }
 0x2b0   : > { %p3761_p2 = scmp.ne.s32.totalorder %s3739_s20, 0  ;;  %s2236_s22 = scalar_lea.sflag [#allocation4], %s2235_s4 }
 0x2b2   : > { %p2794_p5 = pnand %p2807_p9, %p3761_p2 }
 0x2b4   : > { %p2795_p12 = pneg %p2794_p5 }
 0x2b6   : > { %3255 = dma.done.wait (%p2795_p12), %s2236_s22, 768  }
 0x2b7   : > { %3257 = vsyncadd (%p2795_p12), %s2236_s22, 4294966528  ;;  %s2245_s21 = scalar_lea.sflag [#allocation13], %s2235_s4 }
 0x2b8   : > { %3259 = dma.done.wait (%p2795_p12), %s2245_s21, 768  }
 0x2b9   : > { %3261 = vsyncadd (%p2795_p12), %s2245_s21, 4294966528  ;;  %s3762_s16 = sld [smem:[#allocation21_spill]]  ;;  %s3765_s13 = smov %s3268_s14 }
 0x2ba   : > { %s3763_s24 = sld [smem:[#allocation20_spill]] }
 0x2bb   : > { %s3764_s15 = sld [smem:[#allocation22_spill]] }
 0x2bf   : > { %p31_p0 = scmp.ge.s32.totalorder %s3762_s16, 5  }
 0x2c0   : > { %s3766_s14 = smov %s3763_s24 }
 0x2c1   :  { %33 = sbr.rel (!%p31_p0) target bundleno = 15 (0xf), region = 151 }
 0x2c6   :  { %2250 = vsyncpa [#allocation3], 1 }
 0x2c7   :  { %2252 = vsyncpa [#allocation3 + $0x1], 1 }
 0x2c8   :  { %2253 = vsyncpa [#allocation6], 1 }
 0x2c9   :  { %2255 = vsyncpa [#allocation6 + $0x1], 1 }
 0x2ca   :  { %2256 = vsyncpa [#allocation9], 1 }
 0x2cb   :  { %2257 = vsyncpa [#allocation4], 1 }
 0x2cc   :  { %2259 = vsyncpa [#allocation4 + $0x1], 1 }
 0x2cd   :  { %2260 = vsyncpa [#allocation13], 1 }
 0x2ce   :  { %2262 = vsyncpa [#allocation13 + $0x1], 1 }

</bundles_post_ra>
